<compile_context>
chip_gen: v6e
topology: v6e:2x2x1
jax: 0.10.0
libtpu: 0.0.40
codegen_flags: <defaults>
</compile_context>

<pallas_src>
import functools

import jax
import jax.numpy as jnp
import numpy as np
from jax import lax
from jax.experimental import pallas as pl
from jax.experimental.pallas import tpu as pltpu

LANE = 128


def _travel_time_kernel(dloc_ref, offset_ref, ptype_ref, ptime_ref, pweight_ref,
                        pred_ref, partial_ref, *, inv_vp, inv_vs):
    # Squared distance from precomputed dx/dy/dz slabs (pure VPU; sqrt -> EUP).
    dx = dloc_ref[0]
    dy = dloc_ref[1]
    dz = dloc_ref[2]
    dist = jnp.sqrt(dx * dx + dy * dy + dz * dz)

    # phase_type arrives as int8 (-1 = padding); upcast once on the VPU.
    ptype = ptype_ref[...].astype(jnp.int32)     # (R, 128)
    is_p = ptype == 0
    is_s = ptype == 1

    # travel time: constant-select + multiply instead of a per-element divide.
    inv_v = jnp.where(is_p, jnp.float32(inv_vp), jnp.float32(inv_vs))
    t = dist * inv_v + offset_ref[...]           # offset = event_time + station_dt
    pred_ref[...] = t                            # unmasked, lane-dense store

    # Huber (delta=1.0) * weight; padding contributes 0 (pweight padded with 0).
    err = t - ptime_ref[...]
    abs_err = jnp.abs(err)
    huber = jnp.where(abs_err < 1.0, 0.5 * err * err, abs_err - 0.5)
    w = huber * pweight_ref[...]

    m0 = is_p.astype(jnp.float32)
    m1 = is_s.astype(jnp.float32)
    s_w0 = jnp.sum(w * m0)
    s_m0 = jnp.sum(m0)
    s_w1 = jnp.sum(w * m1)
    s_m1 = jnp.sum(m1)

    # Pack the 4 per-tile partial sums into lanes 0..3 of a (1, 1, 128) block.
    lane = lax.broadcasted_iota(jnp.int32, (1, 1, LANE), 2)
    partial_ref[...] = jnp.where(
        lane == 0, s_w0,
        jnp.where(lane == 1, s_m0,
                  jnp.where(lane == 2, s_w1,
                            jnp.where(lane == 3, s_m1, jnp.float32(0.0)))))


def travel_time_forward(params, station_index, event_index, phase_type,
                        phase_time, phase_weight,
                        velocity=(6.0, 6.0 / 1.73), block_rows=1024):
    n = station_index.shape[0]

    # ---- glue: embedding gathers (nn.Embedding lookups), fused with the ----
    # ---- delta / offset computation so the kernel reads fewer streams.   ----
    # Transpose the TINY tables first -> gathers produce (3, n) directly,
    # avoiding a full-size (n,3) transpose pass in XLA.
    ev_loc_t = params["event_loc"].astype(jnp.float32).T        # (3, num_event)
    st_loc_t = params["station_loc"].astype(jnp.float32).T      # (3, num_station)
    dloc_g = ev_loc_t[:, event_index] - st_loc_t[:, station_index]   # (3, n)

    ev_time_g = params["event_time"][event_index, 0].astype(jnp.float32)        # (n,)
    sdt_g = params["station_dt"][station_index, phase_type].astype(jnp.float32)  # (n,)
    offset_g = ev_time_g + sdt_g                                                  # (n,)

    # ---- layout: dense (rows, 128) slabs, padded once ----
    def round32(x):
        return ((x + 31) // 32) * 32

    rows_needed = pl.cdiv(n, LANE)
    # block_rows: multiple of 32 (int8 min tile is (32,128)), >= 32.
    block_rows = max(32, min(block_rows, round32(rows_needed)))
    block_rows = round32(block_rows)
    # For non-trivial problems keep >= 2 tiles so a 2-TC chip (v7x) can shard
    # the parallel grid axis across both TensorCores.
    if rows_needed >= 64:
        block_rows = min(block_rows, round32(pl.cdiv(rows_needed, 2)))

    rows_pad = pl.cdiv(rows_needed, block_rows) * block_rows
    num_tiles = rows_pad // block_rows
    n_pad = rows_pad * LANE
    pad = n_pad - n

    def lanes(x, dtype=jnp.float32, fill=0):        # (n,) -> (rows_pad, 128)
        return jnp.pad(x.astype(dtype), (0, pad),
                       constant_values=fill).reshape(rows_pad, LANE)

    dloc_p = jnp.pad(dloc_g, ((0, 0), (0, pad))).reshape(3, rows_pad, LANE)
    offset_p = lanes(offset_g)
    ptype_p = lanes(phase_type, jnp.int8, -1)       # int8 stream, -1 = padding
    ptime_p = lanes(phase_time)
    pweight_p = lanes(phase_weight)

    kernel = functools.partial(_travel_time_kernel,
                               inv_vp=1.0 / float(velocity[0]),
                               inv_vs=1.0 / float(velocity[1]))

    row_spec = pl.BlockSpec((block_rows, LANE), lambda i: (i, 0))
    dloc_spec = pl.BlockSpec((3, block_rows, LANE), lambda i: (0, i, 0))

    # Per-tile VMEM footprint (double-buffered) + headroom, declared explicitly.
    tile_bytes = block_rows * LANE * (3 * 4 + 4 + 1 + 4 + 4 + 4)
    vmem_limit_bytes = int(min(48 << 20, max(16 << 20, 3 * tile_bytes)))

    pred_p, partials = pl.pallas_call(
        kernel,
        grid=(num_tiles,),
        in_specs=[dloc_spec, row_spec, row_spec, row_spec, row_spec],
        out_specs=(row_spec,
                   pl.BlockSpec((1, 1, LANE), lambda i: (i, 0, 0))),
        out_shape=(jax.ShapeDtypeStruct((rows_pad, LANE), jnp.float32),
                   jax.ShapeDtypeStruct((num_tiles, 1, LANE), jnp.float32)),
        compiler_params=pltpu.CompilerParams(
            dimension_semantics=("parallel",),
            vmem_limit_bytes=vmem_limit_bytes),
    )(dloc_p, offset_p, ptype_p, ptime_p, pweight_p)

    # Finalize the two per-type means from the GLOBAL partial sums (correct
    # regardless of tile count; per-tile means must never be summed).
    sums = jnp.sum(partials.reshape(num_tiles, LANE), axis=0)
    loss = sums[0] / sums[1] + sums[2] / sums[3]
    pred = pred_p.reshape(n_pad)[:n]
    return {"phase_time": pred, "loss": loss}


def reference_forward(params, station_index, event_index, phase_type,
                      phase_time, phase_weight, velocity=(6.0, 6.0 / 1.73)):
    """Pure-JAX reference mirroring the PyTorch forward (eikonal=None, no DD)."""
    st_loc_g = params["station_loc"][station_index]
    st_dt_g = params["station_dt"][station_index]
    ev_loc_g = params["event_loc"][event_index]
    ev_time_g = params["event_time"][event_index][:, 0]

    dist = jnp.linalg.norm(ev_loc_g - st_loc_g, axis=-1)
    vel = jnp.where(phase_type == 0, velocity[0], velocity[1])
    tt = dist / vel
    sdt = jnp.where(phase_type == 0, st_dt_g[:, 0], st_dt_g[:, 1])
    t = ev_time_g + tt + sdt

    err = t - phase_time
    abs_err = jnp.abs(err)
    huber = jnp.where(abs_err < 1.0, 0.5 * err * err, abs_err - 0.5)
    loss = 0.0
    for ty in (0, 1):
        m = (phase_type == ty).astype(jnp.float32)
        loss += jnp.sum(huber * phase_weight * m) / jnp.sum(m)
    return t.astype(jnp.float32), jnp.float32(loss)


if __name__ == "__main__":
    num_event = 8
    num_station = 4
    n_phase = 24

    key = jax.random.PRNGKey(0)
    k1, k2, k3, k4, k5, k6, k7, k8 = jax.random.split(key, 8)

    # Deterministic parameter init (nn.Embedding-like weights).
    params = {
        "event_loc": jax.random.normal(k1, (num_event, 3), jnp.float32) * 10.0,
        "event_time": jax.random.normal(k2, (num_event, 1), jnp.float32),
        "station_loc": jax.random.normal(k3, (num_station, 3), jnp.float32) * 10.0,
        "station_dt": jax.random.normal(k4, (num_station, 2), jnp.float32) * 0.1,
    }

    station_index = jax.random.randint(k5, (n_phase,), 0, num_station, jnp.int32)
    event_index = jax.random.randint(k6, (n_phase,), 0, num_event, jnp.int32)
    # Ensure both phase types are present (alternating P/S picks).
    phase_type = jnp.array([i % 2 for i in range(n_phase)], jnp.int32)
    phase_time = jax.random.normal(k7, (n_phase,), jnp.float32) + 3.0
    phase_weight = jax.random.uniform(k8, (n_phase,), jnp.float32, 0.5, 1.5)

    out = travel_time_forward(params, station_index, event_index, phase_type,
                              phase_time, phase_weight)
    jax.block_until_ready(out)

    ref_t, ref_loss = reference_forward(params, station_index, event_index,
                                        phase_type, phase_time, phase_weight)
    np.testing.assert_allclose(np.asarray(out["phase_time"]),
                               np.asarray(ref_t), rtol=1e-5, atol=1e-5)
    np.testing.assert_allclose(np.asarray(out["loss"]),
                               np.asarray(ref_loss), rtol=1e-5, atol=1e-5)

    print("KERNEL_OK")
</pallas_src>

<mosaic_0001>
module attributes {stable_mosaic.version = 11 : i64} {
  func.func @_travel_time_kernel(%arg0: i32, %arg1: memref<3x32x128xf32, #tpu.memory_space<vmem>>, %arg2: memref<32x128xf32, #tpu.memory_space<vmem>>, %arg3: memref<32x128xi8, #tpu.memory_space<vmem>>, %arg4: memref<32x128xf32, #tpu.memory_space<vmem>>, %arg5: memref<32x128xf32, #tpu.memory_space<vmem>>, %arg6: memref<32x128xf32, #tpu.memory_space<vmem>>, %arg7: memref<1x1x128xf32, #tpu.memory_space<vmem>>) attributes {dimension_semantics = [#tpu.dimension_semantics<parallel>], iteration_bounds = array<i64: 1>, scalar_prefetch = 0 : i64, scratch_operands = 0 : i64, tpu.core_type = #tpu.core_type<tc>, window_params = [{transform_indices = @transform_0, window_bounds = array<i64: 3, 32, 128>}, {transform_indices = @transform_1, window_bounds = array<i64: 32, 128>}, {transform_indices = @transform_2, window_bounds = array<i64: 32, 128>}, {transform_indices = @transform_3, window_bounds = array<i64: 32, 128>}, {transform_indices = @transform_4, window_bounds = array<i64: 32, 128>}, {transform_indices = @transform_5, window_bounds = array<i64: 32, 128>}, {transform_indices = @transform_6, window_bounds = array<i64: 1, 1, 128>}]} {
    %c0 = arith.constant 0 : index
    %c0_0 = arith.constant 0 : index
    %c0_1 = arith.constant 0 : index
    %0 = vector.load %arg1[%c0, %c0_0, %c0_1] : memref<3x32x128xf32, #tpu.memory_space<vmem>>, vector<1x32x128xf32>
    %1 = vector.shape_cast %0 : vector<1x32x128xf32> to vector<32x128xf32>
    %c1 = arith.constant 1 : index
    %c0_2 = arith.constant 0 : index
    %c0_3 = arith.constant 0 : index
    %2 = vector.load %arg1[%c1, %c0_2, %c0_3] : memref<3x32x128xf32, #tpu.memory_space<vmem>>, vector<1x32x128xf32>
    %3 = vector.shape_cast %2 : vector<1x32x128xf32> to vector<32x128xf32>
    %c2 = arith.constant 2 : index
    %c0_4 = arith.constant 0 : index
    %c0_5 = arith.constant 0 : index
    %4 = vector.load %arg1[%c2, %c0_4, %c0_5] : memref<3x32x128xf32, #tpu.memory_space<vmem>>, vector<1x32x128xf32>
    %5 = vector.shape_cast %4 : vector<1x32x128xf32> to vector<32x128xf32>
    %6 = arith.mulf %1, %1 : vector<32x128xf32>
    %7 = arith.mulf %3, %3 : vector<32x128xf32>
    %8 = arith.addf %6, %7 : vector<32x128xf32>
    %9 = arith.mulf %5, %5 : vector<32x128xf32>
    %10 = arith.addf %8, %9 : vector<32x128xf32>
    %11 = math.sqrt %10 : vector<32x128xf32>
    %c0_6 = arith.constant 0 : index
    %c0_7 = arith.constant 0 : index
    %12 = vector.load %arg3[%c0_6, %c0_7] : memref<32x128xi8, #tpu.memory_space<vmem>>, vector<32x128xi8>
    %13 = arith.extsi %12 : vector<32x128xi8> to vector<32x128xi32>
    %c0_i32 = arith.constant 0 : i32
    %14 = vector.broadcast %c0_i32 : i32 to vector<32x128xi32>
    %15 = arith.cmpi eq, %13, %14 : vector<32x128xi32>
    %c1_i32 = arith.constant 1 : i32
    %16 = vector.broadcast %c1_i32 : i32 to vector<32x128xi32>
    %17 = arith.cmpi eq, %13, %16 : vector<32x128xi32>
    %cst = arith.constant 0.166666672 : f32
    %cst_8 = arith.constant 0.288333327 : f32
    %18 = vector.broadcast %cst : f32 to vector<32x128xf32>
    %19 = vector.broadcast %cst_8 : f32 to vector<32x128xf32>
    %20 = arith.select %15, %18, %19 : vector<32x128xi1>, vector<32x128xf32>
    %21 = arith.mulf %11, %20 : vector<32x128xf32>
    %c0_9 = arith.constant 0 : index
    %c0_10 = arith.constant 0 : index
    %22 = vector.load %arg2[%c0_9, %c0_10] : memref<32x128xf32, #tpu.memory_space<vmem>>, vector<32x128xf32>
    %23 = arith.addf %21, %22 : vector<32x128xf32>
    %c0_11 = arith.constant 0 : index
    %c0_12 = arith.constant 0 : index
    %24 = vector.load %arg6[%c0_11, %c0_12] : memref<32x128xf32, #tpu.memory_space<vmem>>, vector<32x128xf32>
    tpu.vector_store %arg6[%c0_11, %c0_12], %23 {strides = array<i32>} : memref<32x128xf32, #tpu.memory_space<vmem>>, vector<32x128xf32>,
    %c0_13 = arith.constant 0 : index
    %c0_14 = arith.constant 0 : index
    %25 = vector.load %arg4[%c0_13, %c0_14] : memref<32x128xf32, #tpu.memory_space<vmem>>, vector<32x128xf32>
    %26 = arith.subf %23, %25 : vector<32x128xf32>
    %27 = math.absf %26 : vector<32x128xf32>
    %cst_15 = arith.constant 1.000000e+00 : f32
    %28 = vector.broadcast %cst_15 : f32 to vector<32x128xf32>
    %29 = arith.cmpf olt, %27, %28 : vector<32x128xf32>
    %cst_16 = arith.constant 5.000000e-01 : f32
    %30 = vector.broadcast %cst_16 : f32 to vector<32x128xf32>
    %31 = arith.mulf %30, %26 : vector<32x128xf32>
    %32 = arith.mulf %31, %26 : vector<32x128xf32>
    %cst_17 = arith.constant 5.000000e-01 : f32
    %33 = vector.broadcast %cst_17 : f32 to vector<32x128xf32>
    %34 = arith.subf %27, %33 : vector<32x128xf32>
    %35 = arith.select %29, %32, %34 : vector<32x128xi1>, vector<32x128xf32>
    %c0_18 = arith.constant 0 : index
    %c0_19 = arith.constant 0 : index
    %36 = vector.load %arg5[%c0_18, %c0_19] : memref<32x128xf32, #tpu.memory_space<vmem>>, vector<32x128xf32>
    %37 = arith.mulf %35, %36 : vector<32x128xf32>
    %38 = arith.extui %15 : vector<32x128xi1> to vector<32x128xi32>
    %39 = arith.sitofp %38 : vector<32x128xi32> to vector<32x128xf32>
    %40 = arith.extui %17 : vector<32x128xi1> to vector<32x128xi32>
    %41 = arith.sitofp %40 : vector<32x128xi32> to vector<32x128xf32>
    %42 = arith.mulf %37, %39 : vector<32x128xf32>
    %43 = vector.shape_cast %42 : vector<32x128xf32> to vector<1x32x128xf32>
    %cst_20 = arith.constant dense<0.000000e+00> : vector<1xf32>
    %44 = vector.multi_reduction <add>, %43, %cst_20 [1, 2] : vector<1x32x128xf32> to vector<1xf32>
    %45 = vector.shape_cast %44 : vector<1xf32> to vector<1x1x1xf32>
    %46 = vector.extract %45[0, 0, 0] : f32 from vector<1x1x1xf32>
    %47 = vector.shape_cast %39 : vector<32x128xf32> to vector<1x32x128xf32>
    %cst_21 = arith.constant dense<0.000000e+00> : vector<1xf32>
    %48 = vector.multi_reduction <add>, %47, %cst_21 [1, 2] : vector<1x32x128xf32> to vector<1xf32>
    %49 = vector.shape_cast %48 : vector<1xf32> to vector<1x1x1xf32>
    %50 = vector.extract %49[0, 0, 0] : f32 from vector<1x1x1xf32>
    %51 = arith.mulf %37, %41 : vector<32x128xf32>
    %52 = vector.shape_cast %51 : vector<32x128xf32> to vector<1x32x128xf32>
    %cst_22 = arith.constant dense<0.000000e+00> : vector<1xf32>
    %53 = vector.multi_reduction <add>, %52, %cst_22 [1, 2] : vector<1x32x128xf32> to vector<1xf32>
    %54 = vector.shape_cast %53 : vector<1xf32> to vector<1x1x1xf32>
    %55 = vector.extract %54[0, 0, 0] : f32 from vector<1x1x1xf32>
    %56 = vector.shape_cast %41 : vector<32x128xf32> to vector<1x32x128xf32>
    %cst_23 = arith.constant dense<0.000000e+00> : vector<1xf32>
    %57 = vector.multi_reduction <add>, %56, %cst_23 [1, 2] : vector<1x32x128xf32> to vector<1xf32>
    %58 = vector.shape_cast %57 : vector<1xf32> to vector<1x1x1xf32>
    %59 = vector.extract %58[0, 0, 0] : f32 from vector<1x1x1xf32>
    %60 = tpu.iota {dimensions = array<i32: 2>} : vector<1x1x128xi32>
    %c0_i32_24 = arith.constant 0 : i32
    %61 = vector.broadcast %c0_i32_24 : i32 to vector<1x1x128xi32>
    %62 = arith.cmpi eq, %60, %61 : vector<1x1x128xi32>
    %c1_i32_25 = arith.constant 1 : i32
    %63 = vector.broadcast %c1_i32_25 : i32 to vector<1x1x128xi32>
    %64 = arith.cmpi eq, %60, %63 : vector<1x1x128xi32>
    %c2_i32 = arith.constant 2 : i32
    %65 = vector.broadcast %c2_i32 : i32 to vector<1x1x128xi32>
    %66 = arith.cmpi eq, %60, %65 : vector<1x1x128xi32>
    %c3_i32 = arith.constant 3 : i32
    %67 = vector.broadcast %c3_i32 : i32 to vector<1x1x128xi32>
    %68 = arith.cmpi eq, %60, %67 : vector<1x1x128xi32>
    %cst_26 = arith.constant 0.000000e+00 : f32
    %69 = vector.broadcast %59 : f32 to vector<1x1x128xf32>
    %70 = vector.broadcast %cst_26 : f32 to vector<1x1x128xf32>
    %71 = arith.select %68, %69, %70 : vector<1x1x128xi1>, vector<1x1x128xf32>
    %72 = vector.broadcast %55 : f32 to vector<1x1x128xf32>
    %73 = arith.select %66, %72, %71 : vector<1x1x128xi1>, vector<1x1x128xf32>
    %74 = vector.broadcast %50 : f32 to vector<1x1x128xf32>
    %75 = arith.select %64, %74, %73 : vector<1x1x128xi1>, vector<1x1x128xf32>
    %76 = vector.broadcast %46 : f32 to vector<1x1x128xf32>
    %77 = arith.select %62, %76, %75 : vector<1x1x128xi1>, vector<1x1x128xf32>
    %c0_27 = arith.constant 0 : index
    %c0_28 = arith.constant 0 : index
    %c0_29 = arith.constant 0 : index
    %78 = vector.load %arg7[%c0_27, %c0_28, %c0_29] : memref<1x1x128xf32, #tpu.memory_space<vmem>>, vector<1x1x128xf32>
    tpu.vector_store %arg7[%c0_27, %c0_28, %c0_29], %77 {strides = array<i32>} : memref<1x1x128xf32, #tpu.memory_space<vmem>>, vector<1x1x128xf32>,
    return
  }
  func.func @transform_0(%arg0: i32) -> (i32, i32, i32) {
    %c0_i32 = arith.constant 0 : i32
    %c0_i32_0 = arith.constant 0 : i32
    %c0_i32_1 = arith.constant 0 : i32
    return %c0_i32, %arg0, %c0_i32_0 : i32, i32, i32
  }
  func.func @transform_1(%arg0: i32) -> (i32, i32) {
    %c0_i32 = arith.constant 0 : i32
    %c0_i32_0 = arith.constant 0 : i32
    return %arg0, %c0_i32 : i32, i32
  }
  func.func @transform_2(%arg0: i32) -> (i32, i32) {
    %c0_i32 = arith.constant 0 : i32
    %c0_i32_0 = arith.constant 0 : i32
    return %arg0, %c0_i32 : i32, i32
  }
  func.func @transform_3(%arg0: i32) -> (i32, i32) {
    %c0_i32 = arith.constant 0 : i32
    %c0_i32_0 = arith.constant 0 : i32
    return %arg0, %c0_i32 : i32, i32
  }
  func.func @transform_4(%arg0: i32) -> (i32, i32) {
    %c0_i32 = arith.constant 0 : i32
    %c0_i32_0 = arith.constant 0 : i32
    return %arg0, %c0_i32 : i32, i32
  }
  func.func @transform_5(%arg0: i32) -> (i32, i32) {
    %c0_i32 = arith.constant 0 : i32
    %c0_i32_0 = arith.constant 0 : i32
    return %arg0, %c0_i32 : i32, i32
  }
  func.func @transform_6(%arg0: i32) -> (i32, i32, i32) {
    %c0_i32 = arith.constant 0 : i32
    %c0_i32_0 = arith.constant 0 : i32
    %c0_i32_1 = arith.constant 0 : i32
    return %arg0, %c0_i32, %c0_i32_0 : i32, i32, i32
  }
}

</mosaic_0001>

<bundles_post_ra>
// kernel: tpu_custom_call.1
= control target key start
LH: loop header
LB: loop body
LE: loop exit
PB: predicated region body
PF: predicated region fallthrough
CT: control target
= control target key end

     0   :  { %12 = vsyncpa [#allocation3], 0  ;;  %s698_s0 = inlined_call_operand.hbm [shape: f32[3,32,128], index: 0, kind: input, shape index: {}]   ;;  %s699_s1 = inlined_call_operand.hbm [shape: f32[32,128], index: 1, kind: input, shape index: {}]   ;;  %s700_s2 = inlined_call_operand.hbm [shape: s8[32,128], index: 2, kind: input, shape index: {}]   ;;  %s701_s3 = inlined_call_operand.hbm [shape: f32[32,128], index: 3, kind: input, shape index: {}]   ;;  %s702_s4 = inlined_call_operand.hbm [shape: f32[32,128], index: 4, kind: input, shape index: {}]   ;;  %s703_s5 = inlined_call_operand.hbm [shape: f32[32,128], index: 5, kind: output, shape index: {0}]   ;;  %s704_s6 = inlined_call_operand.hbm [shape: f32[1,1,128], index: 6, kind: output, shape index: {1}]  }
   0x1   :  { %13 = vsyncpa [#allocation6], 0 }
   0x2   :  { %14 = vsyncpa [#allocation9], 0 }
   0x3   :  { %15 = vsyncpa [#allocation4], 0 }
   0x4   :  { %16 = vsyncpa [#allocation13], 0  ;;  %s534_s21 = smov [#allocation5]   ;;  %s535_s23 = smov [#allocation8]  }
   0x5   :  { %s34_s22 = sshll.u32 %s534_s21, 4  ;;  %s56_s24 = sshll.u32 %s535_s23, 4  ;;  %s35_s22 = int_to_ptr.vmem [resolvable:$true] %s34_s22  ;;  %s57_s24 = int_to_ptr.vmem [resolvable:$true] %s56_s24 }
   0x6   :  { %s392_s25 = scalar_lea.vmem %s35_s22, 512  ;;  %p397_p1 = scmp.lt.s32.totalorder %s35_s22, %s35_s22 }
   0x7   :  { %p393_p0 = scmp.ne.s32.totalorder %s35_s22, %s392_s25  ;;  %p398_p2 = scmp.lt.s32.totalorder %s392_s25, %s392_s25 }
   0x9   :  { %p399_p3 = por %p398_p2, %p397_p1 }
   0xb   :  { %p400_p4 = pnand %p399_p3, %p393_p0 }
   0xd   :  { %403 = shalt.err (!%p400_p4)
}
   0xe   :  { %s536_s26 = smov 128   ;;  %s537_s27 = smov 8  }
   0xf   :  { %40 = dma.hbm_to_vmem [thread:$0]  %s699_s1, 512, %s35_s22, [#allocation6], %s536_s26, %s536_s26, %s537_s27  }
  0x10   :  { %s412_s30 = scalar_lea.vmem %s57_s24, 512  ;;  %p417_p6 = scmp.lt.s32.totalorder %s57_s24, %s57_s24 }
  0x11   :  { %p413_p5 = scmp.ne.s32.totalorder %s57_s24, %s412_s30  ;;  %p418_p7 = scmp.lt.s32.totalorder %s412_s30, %s412_s30 }
  0x13   :  { %p419_p8 = por %p418_p7, %p417_p6 }
  0x15   :  { %p420_p9 = pnand %p419_p8, %p413_p5 }
  0x17   :  { %423 = shalt.err (!%p420_p9)
}
  0x18   :  { %62 = dma.hbm_to_vmem [thread:$0]  %s701_s3, 512, %s57_s24, [#allocation9], %s536_s26, %s536_s26, %s537_s27  }
  0x19   :  { %s538_s9 = smov [#allocation2]   ;;  %s539_s11 = smov [#allocation7]  }
  0x1a   :  { %s22_s10 = sshll.u32 %s538_s9, 4  ;;  %s47_s12 = sshll.u32 %s539_s11, 4  ;;  %s23_s10 = int_to_ptr.vmem [resolvable:$true] %s22_s10  ;;  %s48_s12 = int_to_ptr.vmem [resolvable:$true] %s47_s12 }
  0x1b   :  { %s432_s1 = scalar_lea.vmem %s23_s10, 1536  ;;  %p437_p11 = scmp.lt.s32.totalorder %s23_s10, %s23_s10 }
  0x1c   :  { %p433_p10 = scmp.ne.s32.totalorder %s23_s10, %s432_s1  ;;  %p438_p12 = scmp.lt.s32.totalorder %s432_s1, %s432_s1 }
  0x1e   :  { %p439_p13 = por %p438_p12, %p437_p11 }
  0x20   :  { %p440_p0 = pnand %p439_p13, %p433_p10 }
  0x22   :  { %443 = shalt.err (!%p440_p0)
}
  0x23   :  { %28 = dma.hbm_to_vmem [thread:$0]  %s698_s0, 1536, %s23_s10, [#allocation3], %s536_s26, %s536_s26, %s537_s27  }
  0x24   :  { %s452_s3 = scalar_lea.vmem %s48_s12, 128  ;;  %p457_p2 = scmp.lt.s32.totalorder %s48_s12, %s48_s12 }
  0x25   :  { %p453_p1 = scmp.ne.s32.totalorder %s48_s12, %s452_s3  ;;  %p458_p3 = scmp.lt.s32.totalorder %s452_s3, %s452_s3 }
  0x27   :  { %p459_p4 = por %p458_p3, %p457_p2 }
  0x29   :  { %p460_p5 = pnand %p459_p4, %p453_p1 }
  0x2b   :  { %463 = shalt.err (!%p460_p5)
}
  0x2c   :  { %50 = dma.hbm_to_vmem [thread:$0]  %s700_s2, 128, %s48_s12, [#allocation6]  }
  0x2d   :  { %s540_s17 = smov [#allocation10]  }
  0x2e   :  { %s68_s18 = sshll.u32 %s540_s17, 4  ;;  %s69_s18 = int_to_ptr.vmem [resolvable:$true] %s68_s18 }
  0x2f   :  { %s472_s19 = scalar_lea.vmem %s69_s18, 512  ;;  %p477_p7 = scmp.lt.s32.totalorder %s69_s18, %s69_s18 }
  0x30   :  { %p473_p6 = scmp.ne.s32.totalorder %s69_s18, %s472_s19  ;;  %p478_p8 = scmp.lt.s32.totalorder %s472_s19, %s472_s19 }
  0x32   :  { %p479_p9 = por %p478_p8, %p477_p7 }
  0x34   :  { %p480_p10 = pnand %p479_p9, %p473_p6 }
  0x36   :  { %483 = shalt.err (!%p480_p10)
}
  0x37   :  { %74 = dma.hbm_to_vmem [thread:$0]  %s702_s4, 512, %s69_s18, [#allocation9], %s536_s26, %s536_s26, %s537_s27  }
  0x38   :  { %524 = dma.done.wait [#allocation3], 1536  }
  0x39   :  { %525 = vsyncadd [#allocation3], 4294965760 }
  0x3a   :  { %526 = dma.done.wait [#allocation6], 640  }
  0x3b   :  { %527 = vsyncadd [#allocation6], 4294966656 }
  0x3c   :  { %528 = dma.done.wait [#allocation9], 1024  }
  0x3d   :  { %529 = vsyncadd [#allocation9], 4294966272  ;;  %v90_v0 = vld [vmem:[#allocation2] sm:$0xff]  ;;  %v91_v1 = vld [vmem:[#allocation2 + $0x8] sm:$0xff]  ;;  %v541_v51 = vmov 0.28833333  }
  0x3e   :  { %v92_v2 = vld [vmem:[#allocation2 + $0x10] sm:$0xff]  ;;  %v93_v3 = vld [vmem:[#allocation2 + $0x18] sm:$0xff]  ;;  %v95_v4 = vld [vmem:[#allocation2 + $0x20] sm:$0xff]  ;;  %v104_v6 = vmul.f32 %v90_v0, %v90_v0  ;;  %v105_v7 = vmul.f32 %v91_v1, %v91_v1  ;;  %s543_s2 = smov [#allocation11]  }
  0x3f   :  { %v96_v5 = vld [vmem:[#allocation2 + $0x28] sm:$0xff]  ;;  %v106_v8 = vmul.f32 %v92_v2, %v92_v2  ;;  %v97_v9 = vld [vmem:[#allocation2 + $0x30] sm:$0xff]  ;;  %v98_v10 = vld [vmem:[#allocation2 + $0x38] sm:$0xff]  ;;  %v107_v12 = vmul.f32 %v93_v3, %v93_v3  ;;  %v108_v13 = vmul.f32 %v95_v4, %v95_v4  ;;  %s317_s4 = sshll.u32 %s543_s2, 4  ;;  %s318_s4 = int_to_ptr.vmem [resolvable:$true] %s317_s4 }
  0x40   :  { %v100_v11 = vld [vmem:[#allocation2 + $0x40] sm:$0xff]  ;;  %v109_v14 = vmul.f32 %v96_v5, %v96_v5  ;;  %v101_v15 = vld [vmem:[#allocation2 + $0x48] sm:$0xff]  ;;  %v102_v16 = vld [vmem:[#allocation2 + $0x50] sm:$0xff]  ;;  %v110_v18 = vmul.f32 %v97_v9, %v97_v9  ;;  %v111_v19 = vmul.f32 %v98_v10, %v98_v10  ;;  %s484_s21 = scalar_lea.vmem %s318_s4, 512  ;;  %p489_p12 = scmp.lt.s32.totalorder %s318_s4, %s318_s4 }
  0x41   :  { %v103_v17 = vld [vmem:[#allocation2 + $0x58] sm:$0xff]  ;;  %v116_v20 = vmul.f32 %v100_v11, %v100_v11  ;;  %v112_v21 = vadd.f32 %v108_v13, %v104_v6  ;;  %v117_v23 = vmul.f32 %v101_v15, %v101_v15  ;;  %v118_v24 = vmul.f32 %v102_v16, %v102_v16  ;;  %v152_v32 = vld [vmem:[#allocation7] sm:$0xff]  ;;  %v174_v3 = vld [vmem:[#allocation5 + $0x8] sm:$0xff]  ;;  %p485_p11 = scmp.ne.s32.totalorder %s318_s4, %s484_s21  ;;  %p490_p13 = scmp.lt.s32.totalorder %s484_s21, %s484_s21 }
  0x42   :  { %v113_v22 = vadd.f32 %v109_v14, %v105_v7  ;;  %v114_v25 = vadd.f32 %v110_v18, %v106_v8  ;;  %v115_v26 = vadd.f32 %v111_v19, %v107_v12  ;;  %v119_v27 = vmul.f32 %v103_v17, %v103_v17  ;;  %v173_v62 = vld [vmem:[#allocation5] sm:$0xff]  ;;  %v175_v8 = vld [vmem:[#allocation5 + $0x10] sm:$0xff]  ;;  %v185_v9 = vld [vmem:[#allocation8] sm:$0xff] }
  0x43   :  { %v120_v28 = vadd.f32 %v116_v20, %v112_v21  ;;  %v153_v33 = vunpack.c.0.s8 %v152_v32  ;;  %v154_v34 = vunpack.c.1.s8 %v152_v32  ;;  %v155_v35 = vunpack.c.2.s8 %v152_v32  ;;  %v176_v13 = vld [vmem:[#allocation5 + $0x18] sm:$0xff]  ;;  %v186_v15 = vld [vmem:[#allocation8 + $0x8] sm:$0xff]  ;;  %v188_v20 = vld [vmem:[#allocation8 + $0x18] sm:$0xff]  ;;  %p491_p0 = por %p490_p13, %p489_p12 }
  0x44   :  { %v121_v29 = vadd.f32 %v117_v23, %v113_v22  ;;  %v122_v30 = vadd.f32 %v118_v24, %v114_v25  ;;  %v123_v31 = vadd.f32 %v119_v27, %v115_v26  ;;  %v156_v36 = vunpack.c.3.s8 %v152_v32  ;;  %v187_v18 = vld [vmem:[#allocation8 + $0x10] sm:$0xff] }
  0x45   :  { %376 = vrsqrt.f32 %v120_v28  ;;  %vm126_vm0 = vcmp.eq.f32.partialorder %v120_v28, inf  ;;  %vm128_vm1 = vcmp.eq.f32.partialorder %v120_v28, 0.0  ;;  %v129_v37 = vand.u32 2147483648, %v120_v28  ;;  %v219_v56 = vld [vmem:[#allocation10 + $0x10] sm:$0xff]  ;;  %p492_p1 = pnand %p491_p0, %p485_p11 }
  0x46   :  { %378 = vrsqrt.f32 %v121_v29  ;;  %vm607_vm2 = vcmp.eq.s32.totalorder %v153_v33, 0  ;;  %vm133_vm3 = vcmp.eq.f32.partialorder %v121_v29, inf  ;;  %vm135_vm4 = vcmp.eq.f32.partialorder %v121_v29, 0.0 }
  0x47   :  { %380 = vrsqrt.f32 %v122_v30  ;;  %v136_v39 = vand.u32 2147483648, %v121_v29  ;;  %vm140_vm5 = vcmp.eq.f32.partialorder %v122_v30, inf  ;;  %vm142_vm6 = vcmp.eq.f32.partialorder %v122_v30, 0.0 }
  0x48   :  { %382 = vrsqrt.f32 %v123_v31  ;;  %v143_v41 = vand.u32 2147483648, %v122_v30  ;;  %vm147_vm7 = vcmp.eq.f32.partialorder %v123_v31, inf  ;;  %vm611_vm8 = vcmp.eq.s32.totalorder %v154_v34, 0 }
  0x49   :  { %vm149_vm9 = vcmp.eq.f32.partialorder %v123_v31, 0.0  ;;  %v150_v45 = vand.u32 2147483648, %v123_v31  ;;  %vm615_vm10 = vcmp.eq.s32.totalorder %v155_v35, 0  ;;  %vm619_vm11 = vcmp.eq.s32.totalorder %v156_v36, 0 }
  0x4a   :  { %vm623_vm12 = vcmp.eq.s32.totalorder %v153_v33, 1  ;;  %v165_v52 = vsel %vm607_vm2, 0.16666667, %v541_v51  ;;  %vm630_vm13 = vcmp.eq.s32.totalorder %v154_v34, 1  ;;  %v166_v57 = vsel %vm611_vm8, 0.16666667, %v541_v51 }
  0x4b   :  { %v167_v61 = vsel %vm615_vm10, 0.16666667, %v541_v51  ;;  %v168_v1 = vsel %vm619_vm11, 0.16666667, %v541_v51  ;;  %vm646_vm14 = vcmp.eq.s32.totalorder %v155_v35, 1  ;;  %vm651_vm15 = vcmp.eq.s32.totalorder %v156_v36, 1 }
  0x4c   :  { %v542_v22 = vmov 0.0   ;;  %v217_v51 = vld [vmem:[#allocation10] sm:$0xff] }
  0x4d   :  { %v353_v23 = vsel %vm623_vm12, 1.0, %v542_v22  ;;  %v354_v24 = vsel %vm630_vm13, 1.0, %v542_v22  ;;  %v355_v27 = vsel %vm646_vm14, 1.0, %v542_v22  ;;  %v349_v32 = vsel %vm607_vm2, 1.0, %v542_v22 }
  0x4e   :  { %v350_v36 = vsel %vm611_vm8, 1.0, %v542_v22 }
  0x52   :  { %v377_v40 = vpop.eup %376 }
  0x53   :  { %v379_v43 = vpop.eup %378  ;;  %v125_v44 = vmul.f32 %v377_v40, %v120_v28 }
  0x54   :  { %v381_v47 = vpop.eup %380  ;;  %v132_v48 = vmul.f32 %v379_v43, %v121_v29 }
  0x55   :  { %v383_v53 = vpop.eup %382  ;;  %v127_v54 = vsel %vm126_vm0, %v120_v28, %v125_v44  ;;  %v139_v55 = vmul.f32 %v381_v47, %v122_v30  ;;  %v356_v28 = vsel %vm651_vm15, 1.0, %v542_v22 }
  0x56   :  { %v130_v58 = vsel %vm128_vm1, %v129_v37, %v127_v54  ;;  %v134_v59 = vsel %vm133_vm3, %v121_v29, %v132_v48  ;;  %v146_v60 = vmul.f32 %v383_v53, %v123_v31 }
  0x57   :  { %v137_v63 = vsel %vm135_vm4, %v136_v39, %v134_v59  ;;  %v141_v0 = vsel %vm140_vm5, %v122_v30, %v139_v55  ;;  %v169_v2 = vmul.f32 %v165_v52, %v130_v58  ;;  %v218_v52 = vld [vmem:[#allocation10 + $0x8] sm:$0xff] }
  0x58   :  { %v144_v4 = vsel %vm142_vm6, %v143_v41, %v141_v0  ;;  %v148_v5 = vsel %vm147_vm7, %v123_v31, %v146_v60  ;;  %v170_v7 = vmul.f32 %v166_v57, %v137_v63  ;;  %v220_v57 = vld [vmem:[#allocation10 + $0x18] sm:$0xff]  ;;  %v351_v60 = vsel %vm615_vm10, 1.0, %v542_v22 }
  0x59   :  { %v151_v10 = vsel %vm149_vm9, %v150_v45, %v148_v5  ;;  %v171_v12 = vmul.f32 %v167_v61, %v144_v4  ;;  %v177_v14 = vadd.f32 %v173_v62, %v169_v2  ;;  %v352_v61 = vsel %vm619_vm11, 1.0, %v542_v22 }
  0x5a   :  { %v172_v16 = vmul.f32 %v168_v1, %v151_v10  ;;  %v178_v17 = vadd.f32 %v174_v3, %v170_v7  ;;  %v285_v4 = vadd.f32 %v354_v24, %v353_v23  ;;  %v257_v5 = vadd.f32 %v350_v36, %v349_v32 }
  0x5b   :  { %v179_v19 = vadd.f32 %v175_v8, %v171_v12  ;;  %v189_v21 = vsub.f32 %v177_v14, %v185_v9  ;;  %181 = vst [vmem:[#allocation11] sm:$0xff] %v177_v14 }
  0x5c   :  { %v180_v25 = vadd.f32 %v176_v13, %v172_v16  ;;  %v190_v26 = vsub.f32 %v178_v17, %v186_v15  ;;  %182 = vst [vmem:[#allocation11 + $0x8] sm:$0xff] %v178_v17  ;;  %v286_v16 = vadd.f32 %v355_v27, %v285_v4  ;;  %v258_v17 = vadd.f32 %v351_v60, %v257_v5 }
  0x5d   :  { %v191_v29 = vsub.f32 %v179_v19, %v187_v18  ;;  %v193_v30 = vand.u32 2147483647, %v189_v21  ;;  %v201_v31 = vmul.f32 0.5, %v189_v21  ;;  %183 = vst [vmem:[#allocation11 + $0x10] sm:$0xff] %v179_v19 }
  0x5e   :  { %v192_v33 = vsub.f32 %v180_v25, %v188_v20  ;;  %v194_v34 = vand.u32 2147483647, %v190_v26  ;;  %v202_v35 = vmul.f32 0.5, %v190_v26  ;;  %184 = vst [vmem:[#allocation11 + $0x18] sm:$0xff] %v180_v25  ;;  %v287_v20 = vadd.f32 %v356_v28, %v286_v16 }
  0x5f   :  { %v195_v37 = vand.u32 2147483647, %v191_v29  ;;  %vm667_vm0 = vcmp.lt.f32.partialorder %v193_v30, 1.0  ;;  %v203_v40 = vmul.f32 0.5, %v191_v29  ;;  %v205_v41 = vmul.f32 %v201_v31, %v189_v21 }
  0x60   :  { %v196_v43 = vand.u32 2147483647, %v192_v33  ;;  %vm671_vm1 = vcmp.lt.f32.partialorder %v194_v34, 1.0  ;;  %v204_v38 = vmul.f32 0.5, %v192_v33  ;;  %v206_v45 = vmul.f32 %v202_v35, %v190_v26 }
  0x61   :  { %vm675_vm2 = vcmp.lt.f32.partialorder %v195_v37, 1.0  ;;  %v207_v42 = vmul.f32 %v203_v40, %v191_v29  ;;  %v345_v48 = vadd.f32 -0.5, %v193_v30  ;;  %v346_v50 = vadd.f32 -0.5, %v194_v34 }
  0x62   :  { %vm200_vm3 = vcmp.lt.f32.partialorder %v196_v43, 1.0  ;;  %v208_v53 = vmul.f32 %v204_v38, %v192_v33  ;;  %v347_v54 = vadd.f32 -0.5, %v195_v37  ;;  %v348_v55 = vadd.f32 -0.5, %v196_v43 }
  0x63   :  { %v213_v58 = vsel %vm667_vm0, %v205_v41, %v345_v48  ;;  %v214_v59 = vsel %vm671_vm1, %v206_v45, %v346_v50  ;;  %v259_v21 = vadd.f32 %v352_v61, %v258_v17 }
  0x64   :  { %v215_v62 = vsel %vm675_vm2, %v207_v42, %v347_v54  ;;  %v216_v63 = vsel %vm200_vm3, %v208_v53, %v348_v55  ;;  %v221_v0 = vmul.f32 %v217_v51, %v213_v58  ;;  %v222_v1 = vmul.f32 %v218_v52, %v214_v59 }
  0x65   :  { %v223_v2 = vmul.f32 %v219_v56, %v215_v62  ;;  %v224_v3 = vmul.f32 %v220_v57, %v216_v63 }
  0x66   :  { %v269_v6 = vmul.f32 %v353_v23, %v221_v0  ;;  %v270_v7 = vmul.f32 %v354_v24, %v222_v1  ;;  %v241_v8 = vmul.f32 %v349_v32, %v221_v0  ;;  %v242_v9 = vmul.f32 %v350_v36, %v222_v1 }
  0x67   :  { %v271_v10 = vmul.f32 %v355_v27, %v223_v2  ;;  %v243_v46 = vmul.f32 %v351_v60, %v223_v2  ;;  %v272_v11 = vmul.f32 %v356_v28, %v224_v3  ;;  %v244_v49 = vmul.f32 %v352_v61, %v224_v3 }
  0x68   :  { %v273_v12 = vadd.f32 %v270_v7, %v269_v6  ;;  %v245_v13 = vadd.f32 %v242_v9, %v241_v8 }
  0x6a   :  { %v274_v14 = vadd.f32 %v273_v12, %v271_v10  ;;  %v246_v15 = vadd.f32 %v245_v13, %v243_v46 }
  0x6c   :  { %v275_v18 = vadd.f32 %v274_v14, %v272_v11  ;;  %v247_v19 = vadd.f32 %v246_v15, %v244_v49 }
  0x6e   :  { %276 = vadd.xlane.f32.xlu1 %v275_v18  ;;  %248 = vadd.xlane.f32.xlu0 %v247_v19 }
  0x72   :  { %288 = vadd.xlane.f32.xlu1 %v287_v20  ;;  %260 = vadd.xlane.f32.xlu0 %v259_v21 }
  0x73   :  { %495 = shalt.err (!%p492_p1)
}
  0x74   :  { %323 = dma.vmem_to_hbm [thread:$0]  %s318_s4, 512, %s703_s5, [#allocation4], %s536_s26, %s536_s26, %s537_s27   ;;  %v297_v52 = vlaneseq }
  0x75   :  { %s544_s27 = smov [#allocation12]  }
  0x76   :  { %v298_v53 = vand.u32 127, %v297_v52  ;;  %s330_s28 = sshll.u32 %s544_s27, 4  ;;  %s331_s28 = int_to_ptr.vmem [resolvable:$true] %s330_s28 }
  0x77   :  { %s504_s29 = scalar_lea.vmem %s331_s28, 16  ;;  %s508_s30 = scalar_lea.vmem %s331_s28, 32 }
  0x78   :  { %vm302_vm4 = vcmp.eq.s32.totalorder %v298_v53, 3  ;;  %vm301_vm5 = vcmp.eq.s32.totalorder %v298_v53, 2  ;;  %vm300_vm6 = vcmp.eq.s32.totalorder %v298_v53, 1  ;;  %vm299_vm7 = vcmp.eq.s32.totalorder %v298_v53, 0  ;;  %p505_p2 = scmp.ne.s32.totalorder %s331_s28, %s504_s29  ;;  %p509_p3 = scmp.lt.s32.totalorder %s331_s28, %s331_s28 }
  0x79   :  { %p510_p4 = scmp.lt.s32.totalorder %s508_s30, %s504_s29 }
  0x7b   :  { %p511_p5 = por %p510_p4, %p509_p3 }
  0x7d   :  { %p512_p6 = pnand %p511_p5, %p505_p2 }
  0xf7   :  { %v277_v22 = vpop.xlane.xlu1 %276  ;;  %v249_v23 = vpop.xlane.xlu0 %248 }
  0xf8   :  { %v278_v24 = vrot.slane %v277_v22, 4  ;;  %v250_v25 = vrot.slane %v249_v23, 4 }
  0xfa   :  { %v279_v26 = vadd.f32 %v278_v24, %v277_v22  ;;  %v251_v27 = vadd.f32 %v250_v25, %v249_v23 }
  0xfb   :  { %v289_v28 = vpop.xlane.xlu1 %288  ;;  %v261_v29 = vpop.xlane.xlu0 %260 }
  0xfc   :  { %v280_v30 = vrot.slane %v279_v26, 2  ;;  %v252_v31 = vrot.slane %v251_v27, 2  ;;  %v290_v32 = vrot.slane %v289_v28, 4  ;;  %v262_v33 = vrot.slane %v261_v29, 4 }
  0xfe   :  { %v291_v34 = vadd.f32 %v290_v32, %v289_v28  ;;  %v263_v35 = vadd.f32 %v262_v33, %v261_v29  ;;  %v253_v36 = vadd.f32 %v252_v31, %v251_v27  ;;  %v281_v37 = vadd.f32 %v280_v30, %v279_v26 }
 0x100   :  { %v292_v39 = vrot.slane %v291_v34, 2  ;;  %v264_v40 = vrot.slane %v263_v35, 2  ;;  %v254_v41 = vrot.slane %v253_v36, 1  ;;  %v282_v45 = vrot.slane %v281_v37, 1 }
 0x102   :  { %v293_v43 = vadd.f32 %v292_v39, %v291_v34  ;;  %v265_v44 = vadd.f32 %v264_v40, %v263_v35  ;;  %v255_v38 = vadd.f32 %v254_v41, %v253_v36  ;;  %v283_v51 = vadd.f32 %v282_v45, %v281_v37 }
 0x104   :  { %357 = vpush %v255_v38  ;;  %v266_v47 = vrot.slane %v265_v44, 1  ;;  %v294_v42 = vrot.slane %v293_v43, 1 }
 0x106   :  { %v267_v48 = vadd.f32 %v266_v47, %v265_v44  ;;  %v295_v50 = vadd.f32 %v294_v42, %v293_v43 }
 0x108   :  { %359 = vpush %v267_v48 }
 0x109   :  { %361 = vpush %v283_v51 }
 0x10a   :  { %363 = vpush %v295_v50 }
 0x135   :  { %s358_s5 = spop %357 }
 0x136   :  { %v309_v59 = vstv %s358_s5 }
 0x139   :  { %s360_s24 = spop %359 }
 0x13a   :  { %s362_s25 = spop %361  ;;  %v307_v57 = vstv %s360_s24 }
 0x13b   :  { %v305_v54 = vstv %s362_s25  ;;  %s364_s26 = spop %363 }
 0x13c   :  { %v303_v55 = vstv %s364_s26 }
 0x13d   :  { %v304_v56 = vsel %vm302_vm4, %v303_v55, 0.0 }
 0x13e   :  { %v306_v58 = vsel %vm301_vm5, %v305_v54, %v304_v56 }
 0x13f   :  { %v308_v60 = vsel %vm300_vm6, %v307_v57, %v306_v58 }
 0x140   :  { %v310_v61 = vsel %vm299_vm7, %v309_v59, %v308_v60 }
 0x141   :  { %311 = vst [vmem:[#allocation12] sm:$0x1] %v310_v61 }
 0x142   :  { %515 = shalt.err (!%p512_p6)
}
 0x143   :  { %333 = dma.vmem_to_hbm [thread:$0]  %s331_s28, 16, %s704_s6, [#allocation13]  }
 0x144   :  { %530 = dma.done.wait [#allocation4], 512  }
 0x145   :  { %531 = vsyncadd [#allocation4], 4294966784 }
 0x146   :  { %532 = dma.done.wait [#allocation13], 16  }
 0x147   :  { %533 = vsyncadd [#allocation13], 4294967280 }
 0x148   :  { %340 = vsyncpa [#allocation3], 1 }
 0x149   :  { %341 = vsyncpa [#allocation6], 1 }
 0x14a   :  { %342 = vsyncpa [#allocation9], 1 }
 0x14b   :  { %343 = vsyncpa [#allocation4], 1 }
 0x14c   :  { %344 = vsyncpa [#allocation13], 1 }

</bundles_post_ra>
